<compile_context>
chip_gen: v7x
topology: tpu7x:2x2x1
jax: 0.10.0
libtpu: 0.0.40
codegen_flags: <defaults>
</compile_context>

<pallas_src>
import functools

import jax
import jax.numpy as jnp
import numpy as np
from jax.experimental import pallas as pl
from jax.experimental.pallas import tpu as pltpu

_LW = 128   # lane width of the GCN path and of each output half-tile
_HW = 256   # lane width of the fused-head hidden / merged weight slab


def _slab_offsets(graph_output_dim):
    """Row offsets of each weight block inside the merged (ROWS, 256) slab."""
    r_w1, r_w2, r_w3 = 0, _LW, 2 * _LW
    r_h1 = 3 * _LW
    r_h2 = r_h1 + graph_output_dim
    r_p3 = r_h2 + _HW
    rows = r_p3 + _LW
    return r_w1, r_w2, r_w3, r_h1, r_h2, r_p3, rows


# ----------------------------------------------------------------------------
# Pallas kernel: one grid step = one independent graph-batch ("segment").
# ----------------------------------------------------------------------------
def _step_predictor_kernel(adj_ref, pool_ref, x_ref, w_ref, b_ref, out_ref, *,
                           node_feature_dim, hidden_dim, graph_output_dim,
                           num_operations):
    f32, bf16 = jnp.float32, jnp.bfloat16
    F, H, G, P = node_feature_dim, hidden_dim, graph_output_dim, num_operations
    r_w1, r_w2, r_w3, r_h1, r_h2, r_p3, _ = _slab_offsets(G)

    # per-call activations (cast once to bf16 for the MXU)
    adj = adj_ref[...].astype(bf16)                   # (N, N) normalized Â
    pool = pool_ref[...].astype(bf16)                 # (B, N) mean-pool matrix
    x = x_ref[...].astype(bf16)                       # (N, F) node features

    # constant bf16 weight slab (lane-padded blocks)
    w1 = w_ref[r_w1:r_w1 + F, 0:_LW]                  # (F, 128)
    w2 = w_ref[r_w2:r_w2 + _LW, 0:_LW]                # (128, 128), rows H: zero
    w3 = w_ref[r_w3:r_w3 + _LW, 0:_LW]                # (128, 128), rows H: zero
    w1h = w_ref[r_h1:r_h1 + G, :]                     # (G, 256) fused head L1
    w2h = w_ref[r_h2:r_h2 + _HW, 0:_LW]               # (256, 128) block-diag L2
    wp3 = w_ref[r_p3:r_p3 + _LW, 0:_LW]               # (128, 128) param L3

    # f32 bias slab (BN affines folded with conv biases)
    s1 = b_ref[0:1, 0:_LW]
    t1 = b_ref[1:2, 0:_LW]
    s2 = b_ref[2:3, 0:_LW]
    t2 = b_ref[3:4, 0:_LW]
    b3 = b_ref[4:5, 0:_LW]
    b1h = b_ref[5:6, :]
    b2h = b_ref[6:7, 0:_LW]
    bp3 = b_ref[7:8, 0:_LW]

    def mm(a, b):
        return jnp.dot(a, b, preferred_element_type=f32)

    # --- SimpleGraphEncoder (eval mode: Dropout = identity) ------------------
    # layer 1: Â (X W1), folded (bias + BN) affine, ReLU
    h = mm(adj, mm(x, w1).astype(bf16))
    h = jnp.maximum(h * s1 + t1, 0.0)
    # layer 2
    h = mm(adj, mm(h.astype(bf16), w2).astype(bf16))
    h = jnp.maximum(h * s2 + t2, 0.0)
    # layer 3 fused with global_mean_pool: g = pool (Â (h W3)) + b3
    # (exact because every pool row sums to 1)
    # TODO(synk): an empty graph (all-zero pool row) yields g = b3 here instead
    # of 0; callers never construct empty graphs.
    h = mm(adj, mm(h.astype(bf16), w3).astype(bf16))
    g = mm(pool, h.astype(bf16)) + b3                                  # (B, G)

    # --- fused heads ----------------------------------------------------------
    # h1 lanes: [op-hidden | param-hidden1 | done-hidden | zero pad]  (B, 256)
    # z2 lanes: [op(P) | pv-slot | done(2) | param-hidden2 | zero pad] (B, 128)
    h1 = jnp.maximum(mm(g.astype(bf16), w1h) + b1h, 0.0)
    z2 = mm(h1.astype(bf16), w2h) + b2h
    # param-head third layer: wp3 only reads the param-hidden2 lanes and only
    # writes the pv lane, so z2 + pv assembles the final head tile in place.
    pv = mm(jnp.maximum(z2, 0.0).astype(bf16), wp3) + bp3

    # lane-dense output slab [g | head-tile], two 128-aligned unmasked stores
    out_ref[:, 0:_LW] = g
    out_ref[:, _LW:2 * _LW] = z2 + pv


# ----------------------------------------------------------------------------
# One-time parameter packing (hoisted out of the per-call path).
# ----------------------------------------------------------------------------
def pack_params(params, *, node_feature_dim=20, hidden_dim=64,
                graph_output_dim=128, num_operations=13):
    (w1, b1, s1, t1, w2, b2, s2, t2, w3, b3,
     wo1, bo1, wo2, bo2, wp1, bp1, wp2, bp2, wp3, bp3,
     wd1, bd1, wd2, bd2) = params

    F, H, G, P = node_feature_dim, hidden_dim, graph_output_dim, num_operations
    assert G == _LW and H <= _LW and F <= _LW
    assert 3 * H <= _HW and P + 3 + H <= _LW

    r_w1, r_w2, r_w3, r_h1, r_h2, r_p3, rows = _slab_offsets(G)
    c_pv, c_dn, c_ph = P, P + 1, P + 3          # head-tile lane layout

    f32 = jnp.float32
    w = jnp.zeros((rows, _HW), f32)
    # GCN weights, lane-padded to 128
    w = w.at[r_w1:r_w1 + F, 0:H].set(w1)
    w = w.at[r_w2:r_w2 + H, 0:H].set(w2)
    w = w.at[r_w3:r_w3 + H, 0:G].set(w3)
    # fused head layer 1: columns [op-hidden | param-hidden | done-hidden]
    w = w.at[r_h1:r_h1 + G, 0:H].set(wo1)
    w = w.at[r_h1:r_h1 + G, H:2 * H].set(wp1)
    w = w.at[r_h1:r_h1 + G, 2 * H:3 * H].set(wd1)
    # fused head layer 2 (block diagonal), output columns match head tile
    w = w.at[r_h2:r_h2 + H, 0:P].set(wo2)
    w = w.at[r_h2 + H:r_h2 + 2 * H, c_ph:c_ph + H].set(wp2)
    w = w.at[r_h2 + 2 * H:r_h2 + 3 * H, c_dn:c_dn + 2].set(wd2)
    # param head layer 3: reads param-hidden lanes, writes the pv lane
    w = w.at[r_p3 + c_ph:r_p3 + c_ph + H, c_pv:c_pv + 1].set(wp3)

    b = jnp.zeros((8, _HW), f32)
    b = b.at[0, 0:H].set(s1[0])
    b = b.at[1, 0:H].set((b1 * s1 + t1)[0])     # t1' = b1*scale1 + bias1
    b = b.at[2, 0:H].set(s2[0])
    b = b.at[3, 0:H].set((b2 * s2 + t2)[0])     # t2' = b2*scale2 + bias2
    b = b.at[4, 0:G].set(b3[0])
    b = b.at[5, 0:H].set(bo1[0])
    b = b.at[5, H:2 * H].set(bp1[0])
    b = b.at[5, 2 * H:3 * H].set(bd1[0])
    b = b.at[6, 0:P].set(bo2[0])
    b = b.at[6, c_dn:c_dn + 2].set(bd2[0])
    b = b.at[6, c_ph:c_ph + H].set(bp2[0])
    b = b.at[7, c_pv].set(bp3[0, 0])

    return w.astype(jnp.bfloat16), b            # bf16 weights, f32 biases


# ----------------------------------------------------------------------------
# Forward: adj (S,N,N), pool (S,B,N), x (S,N,F), packed = pack_params(...).
# ----------------------------------------------------------------------------
def step_predictor_forward(adj, pool, x, packed, *, node_feature_dim=20,
                           hidden_dim=64, graph_output_dim=128,
                           num_operations=13):
    w_all, biases = packed
    S, N, _ = adj.shape
    B = pool.shape[1]
    F, H, G, P = node_feature_dim, hidden_dim, graph_output_dim, num_operations
    out_w = 2 * _LW

    kernel = functools.partial(_step_predictor_kernel, node_feature_dim=F,
                               hidden_dim=H, graph_output_dim=G,
                               num_operations=P)

    out = pl.pallas_call(
        kernel,
        out_shape=jax.ShapeDtypeStruct((S, B, out_w), jnp.float32),
        grid=(S,),
        in_specs=[
            pl.BlockSpec((None, N, N), lambda s: (s, 0, 0)),
            pl.BlockSpec((None, B, N), lambda s: (s, 0, 0)),
            pl.BlockSpec((None, N, F), lambda s: (s, 0, 0)),
            pl.BlockSpec(w_all.shape, lambda s: (0, 0)),    # resident constants
            pl.BlockSpec(biases.shape, lambda s: (0, 0)),
        ],
        out_specs=pl.BlockSpec((None, B, out_w), lambda s: (s, 0, 0)),
        compiler_params=pltpu.CompilerParams(
            dimension_semantics=("parallel",)),
    )(adj, pool, x, w_all, biases)

    out = out.reshape(S * B, out_w)
    return {
        "operation_logits": out[:, G:G + P],
        "param_value": out[:, G + P:G + P + 1],
        "done_logits": out[:, G + P + 1:G + P + 3],
        "graph_encoding": out[:, 0:G],
    }


# ----------------------------------------------------------------------------
# Parameter init (PyTorch-style), graph glue, float64 reference.
# ----------------------------------------------------------------------------
def _linear_init(key, fan_in, fan_out):
    kw, kb = jax.random.split(key)
    bound = 1.0 / np.sqrt(fan_in)
    w = jax.random.uniform(kw, (fan_in, fan_out), jnp.float32, -bound, bound)
    b = jax.random.uniform(kb, (1, fan_out), jnp.float32, -bound, bound)
    return w, b


def make_params(key, node_feature_dim=20, hidden_dim=64, graph_output_dim=128,
                num_operations=13):
    keys = jax.random.split(key, 16)
    eps = 1e-5

    w1, b1 = _linear_init(keys[0], node_feature_dim, hidden_dim)
    w2, b2 = _linear_init(keys[1], hidden_dim, hidden_dim)
    w3, b3 = _linear_init(keys[2], hidden_dim, graph_output_dim)

    def bn_fold(kg, kb):
        gamma = 1.0 + 0.1 * jax.random.normal(kg, (1, hidden_dim), jnp.float32)
        beta = 0.1 * jax.random.normal(kb, (1, hidden_dim), jnp.float32)
        mean = jnp.zeros((1, hidden_dim), jnp.float32)
        var = jnp.ones((1, hidden_dim), jnp.float32)
        scale = gamma / jnp.sqrt(var + eps)
        bias = beta - mean * scale
        return scale, bias

    s1, t1 = bn_fold(keys[3], keys[4])
    s2, t2 = bn_fold(keys[5], keys[6])

    wo1, bo1 = _linear_init(keys[7], graph_output_dim, hidden_dim)
    wo2, bo2 = _linear_init(keys[8], hidden_dim, num_operations)
    wp1, bp1 = _linear_init(keys[9], graph_output_dim, hidden_dim)
    wp2, bp2 = _linear_init(keys[10], hidden_dim, hidden_dim)
    wp3, bp3 = _linear_init(keys[11], hidden_dim, 1)
    wd1, bd1 = _linear_init(keys[12], graph_output_dim, hidden_dim)
    wd2, bd2 = _linear_init(keys[13], hidden_dim, 2)

    return (w1, b1, s1, t1, w2, b2, s2, t2, w3, b3,
            wo1, bo1, wo2, bo2, wp1, bp1, wp2, bp2, wp3, bp3,
            wd1, bd1, wd2, bd2)


def build_graph_matrices(edge_index, batch, num_nodes, num_graphs):
    """Dense GCN-normalized adjacency (self-loops) and mean-pool matrix."""
    a = np.zeros((num_nodes, num_nodes), dtype=np.float32)
    src, dst = np.asarray(edge_index)
    a[dst, src] = 1.0
    a = a + np.eye(num_nodes, dtype=np.float32)
    deg = a.sum(axis=1)
    d_inv_sqrt = 1.0 / np.sqrt(np.maximum(deg, 1.0))
    adj = (d_inv_sqrt[:, None] * a) * d_inv_sqrt[None, :]

    pool = np.zeros((num_graphs, num_nodes), dtype=np.float32)
    batch = np.asarray(batch)
    for b in range(num_graphs):
        mask = (batch == b)
        cnt = max(int(mask.sum()), 1)
        pool[b, mask] = 1.0 / cnt
    return jnp.asarray(adj), jnp.asarray(pool)


def _reference_forward(adj, pool, x, params):
    """Unfused float64 numpy reference (original module semantics, eval mode)."""
    p = [np.asarray(t, np.float64) for t in params]
    (w1, b1, s1, t1, w2, b2, s2, t2, w3, b3,
     wo1, bo1, wo2, bo2, wp1, bp1, wp2, bp2, wp3, bp3, wd1, bd1, wd2, bd2) = p
    A = np.asarray(adj, np.float64)
    P = np.asarray(pool, np.float64)
    h = np.asarray(x, np.float64)
    h = A @ (h @ w1) + b1
    h = np.maximum(h * s1 + t1, 0.0)
    h = A @ (h @ w2) + b2
    h = np.maximum(h * s2 + t2, 0.0)
    h = A @ (h @ w3) + b3
    g = P @ h
    ho = np.maximum(g @ wo1 + bo1, 0.0)
    op = ho @ wo2 + bo2
    hp = np.maximum(g @ wp1 + bp1, 0.0)
    hp = np.maximum(hp @ wp2 + bp2, 0.0)
    pv = hp @ wp3 + bp3
    hd = np.maximum(g @ wd1 + bd1, 0.0)
    dn = hd @ wd2 + bd2
    return op, pv, dn, g


if __name__ == "__main__":
    NODE_FEAT = 20
    HIDDEN = 64
    GRAPH_OUT = 128
    NUM_OPS = 13
    N_PER_GRAPH = 8
    GRAPHS_PER_SEG = 4       # graphs per independent graph-batch (segment)
    NUM_SEGS = 2             # segments -> leading "parallel" grid axis
    N = N_PER_GRAPH * GRAPHS_PER_SEG

    key = jax.random.PRNGKey(0)
    key, kparam = jax.random.split(key)
    params = make_params(kparam, NODE_FEAT, HIDDEN, GRAPH_OUT, NUM_OPS)
    # Pack ONCE (cached constant slabs) -- not part of the per-call path.
    packed = pack_params(params, node_feature_dim=NODE_FEAT, hidden_dim=HIDDEN,
                         graph_output_dim=GRAPH_OUT, num_operations=NUM_OPS)
    packed = jax.block_until_ready(packed)

    batch = np.repeat(np.arange(GRAPHS_PER_SEG), N_PER_GRAPH)
    adj_list, pool_list, x_list = [], [], []
    for s in range(NUM_SEGS):
        src, dst = [], []
        for g in range(GRAPHS_PER_SEG):
            base = g * N_PER_GRAPH
            for i in range(N_PER_GRAPH - 1):
                src += [base + i, base + i + 1]
                dst += [base + i + 1, base + i]
            if s == 1:  # segment 1: close each chain into a ring (topology varies)
                src += [base + N_PER_GRAPH - 1, base]
                dst += [base, base + N_PER_GRAPH - 1]
        edge_index = np.stack([np.array(src), np.array(dst)])
        adj_s, pool_s = build_graph_matrices(edge_index, batch, N, GRAPHS_PER_SEG)
        key, kx = jax.random.split(key)
        x_s = jax.random.normal(kx, (N, NODE_FEAT), jnp.float32)
        adj_list.append(adj_s)
        pool_list.append(pool_s)
        x_list.append(x_s)

    adj = jnp.stack(adj_list)      # (S, N, N)
    pool = jnp.stack(pool_list)    # (S, B, N)
    x = jnp.stack(x_list)          # (S, N, F)

    fwd = jax.jit(functools.partial(step_predictor_forward,
                                    node_feature_dim=NODE_FEAT,
                                    hidden_dim=HIDDEN,
                                    graph_output_dim=GRAPH_OUT,
                                    num_operations=NUM_OPS))
    out = fwd(adj, pool, x, packed)
    jax.block_until_ready(out)

    TOTAL = NUM_SEGS * GRAPHS_PER_SEG
    assert out["operation_logits"].shape == (TOTAL, NUM_OPS)
    assert out["param_value"].shape == (TOTAL, 1)
    assert out["done_logits"].shape == (TOTAL, 2)
    assert out["graph_encoding"].shape == (TOTAL, GRAPH_OUT)

    # Numerical check vs. unfused f64 reference (tolerance covers bf16 MXU path).
    ops, pvs, dns, gs = [], [], [], []
    for s in range(NUM_SEGS):
        o, p_, d, g_ = _reference_forward(adj[s], pool[s], x[s], params)
        ops.append(o); pvs.append(p_); dns.append(d); gs.append(g_)
    op_ref = np.concatenate(ops, axis=0)
    pv_ref = np.concatenate(pvs, axis=0)
    dn_ref = np.concatenate(dns, axis=0)
    g_ref = np.concatenate(gs, axis=0)

    np.testing.assert_allclose(np.asarray(out["operation_logits"]), op_ref,
                               rtol=2e-2, atol=2e-2)
    np.testing.assert_allclose(np.asarray(out["param_value"]), pv_ref,
                               rtol=2e-2, atol=2e-2)
    np.testing.assert_allclose(np.asarray(out["done_logits"]), dn_ref,
                               rtol=2e-2, atol=2e-2)
    np.testing.assert_allclose(np.asarray(out["graph_encoding"]), g_ref,
                               rtol=2e-2, atol=2e-2)

    print("KERNEL_OK")
</pallas_src>

<mosaic_0001>
module attributes {stable_mosaic.version = 11 : i64} {
  func.func @_step_predictor_kernel(%arg0: i32, %arg1: memref<1x32x32xf32, #tpu.memory_space<vmem>>, %arg2: memref<1x4x32xf32, #tpu.memory_space<vmem>>, %arg3: memref<1x32x20xf32, #tpu.memory_space<vmem>>, %arg4: memref<896x256xbf16, #tpu.memory_space<vmem>>, %arg5: memref<8x256xf32, #tpu.memory_space<vmem>>, %arg6: memref<1x4x256xf32, #tpu.memory_space<vmem>>) attributes {dimension_semantics = [#tpu.dimension_semantics<parallel>], iteration_bounds = array<i64: 2>, scalar_prefetch = 0 : i64, scratch_operands = 0 : i64, tpu.core_type = #tpu.core_type<tc>, window_params = [{transform_indices = @transform_0, window_bounds = array<i64: 1, 32, 32>}, {transform_indices = @transform_1, window_bounds = array<i64: 1, 4, 32>}, {transform_indices = @transform_2, window_bounds = array<i64: 1, 32, 20>}, {pipeline_mode = #tpu.pipeline_mode<synchronous>, transform_indices = @transform_3, window_bounds = array<i64: 896, 256>}, {pipeline_mode = #tpu.pipeline_mode<synchronous>, transform_indices = @transform_4, window_bounds = array<i64: 8, 256>}, {transform_indices = @transform_5, window_bounds = array<i64: 1, 4, 256>}]} {
    %c0 = arith.constant 0 : index
    %c0_0 = arith.constant 0 : index
    %c0_1 = arith.constant 0 : index
    %0 = vector.load %arg1[%c0, %c0_0, %c0_1] : memref<1x32x32xf32, #tpu.memory_space<vmem>>, vector<1x32x32xf32>
    %1 = vector.shape_cast %0 : vector<1x32x32xf32> to vector<32x32xf32>
    %2 = arith.truncf %1 : vector<32x32xf32> to vector<32x32xbf16>
    %c0_2 = arith.constant 0 : index
    %c0_3 = arith.constant 0 : index
    %c0_4 = arith.constant 0 : index
    %3 = vector.load %arg2[%c0_2, %c0_3, %c0_4] : memref<1x4x32xf32, #tpu.memory_space<vmem>>, vector<1x4x32xf32>
    %4 = vector.shape_cast %3 : vector<1x4x32xf32> to vector<4x32xf32>
    %5 = arith.truncf %4 : vector<4x32xf32> to vector<4x32xbf16>
    %c0_5 = arith.constant 0 : index
    %c0_6 = arith.constant 0 : index
    %c0_7 = arith.constant 0 : index
    %6 = vector.load %arg3[%c0_5, %c0_6, %c0_7] : memref<1x32x20xf32, #tpu.memory_space<vmem>>, vector<1x32x20xf32>
    %7 = vector.shape_cast %6 : vector<1x32x20xf32> to vector<32x20xf32>
    %8 = arith.truncf %7 : vector<32x20xf32> to vector<32x20xbf16>
    %c0_8 = arith.constant 0 : index
    %c0_9 = arith.constant 0 : index
    %9 = vector.load %arg4[%c0_8, %c0_9] : memref<896x256xbf16, #tpu.memory_space<vmem>>, vector<20x128xbf16>
    %c128 = arith.constant 128 : index
    %c0_10 = arith.constant 0 : index
    %10 = vector.load %arg4[%c128, %c0_10] : memref<896x256xbf16, #tpu.memory_space<vmem>>, vector<128x128xbf16>
    %c256 = arith.constant 256 : index
    %c0_11 = arith.constant 0 : index
    %11 = vector.load %arg4[%c256, %c0_11] : memref<896x256xbf16, #tpu.memory_space<vmem>>, vector<128x128xbf16>
    %c384 = arith.constant 384 : index
    %c0_12 = arith.constant 0 : index
    %12 = vector.load %arg4[%c384, %c0_12] : memref<896x256xbf16, #tpu.memory_space<vmem>>, vector<128x256xbf16>
    %c512 = arith.constant 512 : index
    %c0_13 = arith.constant 0 : index
    %13 = vector.load %arg4[%c512, %c0_13] : memref<896x256xbf16, #tpu.memory_space<vmem>>, vector<256x128xbf16>
    %c768 = arith.constant 768 : index
    %c0_14 = arith.constant 0 : index
    %14 = vector.load %arg4[%c768, %c0_14] : memref<896x256xbf16, #tpu.memory_space<vmem>>, vector<128x128xbf16>
    %c0_15 = arith.constant 0 : index
    %c0_16 = arith.constant 0 : index
    %15 = vector.load %arg5[%c0_15, %c0_16] : memref<8x256xf32, #tpu.memory_space<vmem>>, vector<1x128xf32>
    %c1 = arith.constant 1 : index
    %c0_17 = arith.constant 0 : index
    %16 = vector.load %arg5[%c1, %c0_17] : memref<8x256xf32, #tpu.memory_space<vmem>>, vector<1x128xf32>
    %c2 = arith.constant 2 : index
    %c0_18 = arith.constant 0 : index
    %17 = vector.load %arg5[%c2, %c0_18] : memref<8x256xf32, #tpu.memory_space<vmem>>, vector<1x128xf32>
    %c3 = arith.constant 3 : index
    %c0_19 = arith.constant 0 : index
    %18 = vector.load %arg5[%c3, %c0_19] : memref<8x256xf32, #tpu.memory_space<vmem>>, vector<1x128xf32>
    %c4 = arith.constant 4 : index
    %c0_20 = arith.constant 0 : index
    %19 = vector.load %arg5[%c4, %c0_20] : memref<8x256xf32, #tpu.memory_space<vmem>>, vector<1x128xf32>
    %c5 = arith.constant 5 : index
    %c0_21 = arith.constant 0 : index
    %20 = vector.load %arg5[%c5, %c0_21] : memref<8x256xf32, #tpu.memory_space<vmem>>, vector<1x256xf32>
    %c6 = arith.constant 6 : index
    %c0_22 = arith.constant 0 : index
    %21 = vector.load %arg5[%c6, %c0_22] : memref<8x256xf32, #tpu.memory_space<vmem>>, vector<1x128xf32>
    %c7 = arith.constant 7 : index
    %c0_23 = arith.constant 0 : index
    %22 = vector.load %arg5[%c7, %c0_23] : memref<8x256xf32, #tpu.memory_space<vmem>>, vector<1x128xf32>
    %cst = arith.constant dense<0.000000e+00> : vector<32x128xf32>
    %23 = tpu.matmul %8, %9, %cst {dimension_numbers = #tpu.dot_dimension_numbers<[1], [0], [0], [1], [0, 0, 1, 1], [], []>} : vector<32x20xbf16>, vector<20x128xbf16>, vector<32x128xf32> -> vector<32x128xf32>
    %24 = arith.truncf %23 : vector<32x128xf32> to vector<32x128xbf16>
    %cst_24 = arith.constant dense<0.000000e+00> : vector<32x128xf32>
    %25 = tpu.matmul %2, %24, %cst_24 {dimension_numbers = #tpu.dot_dimension_numbers<[1], [0], [0], [1], [0, 0, 1, 1], [], []>} : vector<32x32xbf16>, vector<32x128xbf16>, vector<32x128xf32> -> vector<32x128xf32>
    %26 = vector.broadcast %15 : vector<1x128xf32> to vector<32x128xf32>
    %27 = arith.mulf %25, %26 : vector<32x128xf32>
    %28 = vector.broadcast %16 : vector<1x128xf32> to vector<32x128xf32>
    %29 = arith.addf %27, %28 : vector<32x128xf32>
    %cst_25 = arith.constant 0.000000e+00 : f32
    %30 = vector.broadcast %cst_25 : f32 to vector<32x128xf32>
    %31 = arith.maximumf %29, %30 : vector<32x128xf32>
    %32 = arith.truncf %31 : vector<32x128xf32> to vector<32x128xbf16>
    %cst_26 = arith.constant dense<0.000000e+00> : vector<32x128xf32>
    %33 = tpu.matmul %32, %10, %cst_26 {dimension_numbers = #tpu.dot_dimension_numbers<[1], [0], [0], [1], [0, 0, 1, 1], [], []>} : vector<32x128xbf16>, vector<128x128xbf16>, vector<32x128xf32> -> vector<32x128xf32>
    %34 = arith.truncf %33 : vector<32x128xf32> to vector<32x128xbf16>
    %cst_27 = arith.constant dense<0.000000e+00> : vector<32x128xf32>
    %35 = tpu.matmul %2, %34, %cst_27 {dimension_numbers = #tpu.dot_dimension_numbers<[1], [0], [0], [1], [0, 0, 1, 1], [], []>} : vector<32x32xbf16>, vector<32x128xbf16>, vector<32x128xf32> -> vector<32x128xf32>
    %36 = vector.broadcast %17 : vector<1x128xf32> to vector<32x128xf32>
    %37 = arith.mulf %35, %36 : vector<32x128xf32>
    %38 = vector.broadcast %18 : vector<1x128xf32> to vector<32x128xf32>
    %39 = arith.addf %37, %38 : vector<32x128xf32>
    %cst_28 = arith.constant 0.000000e+00 : f32
    %40 = vector.broadcast %cst_28 : f32 to vector<32x128xf32>
    %41 = arith.maximumf %39, %40 : vector<32x128xf32>
    %42 = arith.truncf %41 : vector<32x128xf32> to vector<32x128xbf16>
    %cst_29 = arith.constant dense<0.000000e+00> : vector<32x128xf32>
    %43 = tpu.matmul %42, %11, %cst_29 {dimension_numbers = #tpu.dot_dimension_numbers<[1], [0], [0], [1], [0, 0, 1, 1], [], []>} : vector<32x128xbf16>, vector<128x128xbf16>, vector<32x128xf32> -> vector<32x128xf32>
    %44 = arith.truncf %43 : vector<32x128xf32> to vector<32x128xbf16>
    %cst_30 = arith.constant dense<0.000000e+00> : vector<32x128xf32>
    %45 = tpu.matmul %2, %44, %cst_30 {dimension_numbers = #tpu.dot_dimension_numbers<[1], [0], [0], [1], [0, 0, 1, 1], [], []>} : vector<32x32xbf16>, vector<32x128xbf16>, vector<32x128xf32> -> vector<32x128xf32>
    %46 = arith.truncf %45 : vector<32x128xf32> to vector<32x128xbf16>
    %cst_31 = arith.constant dense<0.000000e+00> : vector<4x128xf32>
    %47 = tpu.matmul %5, %46, %cst_31 {dimension_numbers = #tpu.dot_dimension_numbers<[1], [0], [0], [1], [0, 0, 1, 1], [], []>} : vector<4x32xbf16>, vector<32x128xbf16>, vector<4x128xf32> -> vector<4x128xf32>
    %48 = vector.broadcast %19 : vector<1x128xf32> to vector<4x128xf32>
    %49 = arith.addf %47, %48 : vector<4x128xf32>
    %50 = arith.truncf %49 : vector<4x128xf32> to vector<4x128xbf16>
    %cst_32 = arith.constant dense<0.000000e+00> : vector<4x256xf32>
    %51 = tpu.matmul %50, %12, %cst_32 {dimension_numbers = #tpu.dot_dimension_numbers<[1], [0], [0], [1], [0, 0, 1, 1], [], []>} : vector<4x128xbf16>, vector<128x256xbf16>, vector<4x256xf32> -> vector<4x256xf32>
    %52 = vector.broadcast %20 : vector<1x256xf32> to vector<4x256xf32>
    %53 = arith.addf %51, %52 : vector<4x256xf32>
    %cst_33 = arith.constant 0.000000e+00 : f32
    %54 = vector.broadcast %cst_33 : f32 to vector<4x256xf32>
    %55 = arith.maximumf %53, %54 : vector<4x256xf32>
    %56 = arith.truncf %55 : vector<4x256xf32> to vector<4x256xbf16>
    %cst_34 = arith.constant dense<0.000000e+00> : vector<4x128xf32>
    %57 = tpu.matmul %56, %13, %cst_34 {dimension_numbers = #tpu.dot_dimension_numbers<[1], [0], [0], [1], [0, 0, 1, 1], [], []>} : vector<4x256xbf16>, vector<256x128xbf16>, vector<4x128xf32> -> vector<4x128xf32>
    %58 = vector.broadcast %21 : vector<1x128xf32> to vector<4x128xf32>
    %59 = arith.addf %57, %58 : vector<4x128xf32>
    %cst_35 = arith.constant 0.000000e+00 : f32
    %60 = vector.broadcast %cst_35 : f32 to vector<4x128xf32>
    %61 = arith.maximumf %59, %60 : vector<4x128xf32>
    %62 = arith.truncf %61 : vector<4x128xf32> to vector<4x128xbf16>
    %cst_36 = arith.constant dense<0.000000e+00> : vector<4x128xf32>
    %63 = tpu.matmul %62, %14, %cst_36 {dimension_numbers = #tpu.dot_dimension_numbers<[1], [0], [0], [1], [0, 0, 1, 1], [], []>} : vector<4x128xbf16>, vector<128x128xbf16>, vector<4x128xf32> -> vector<4x128xf32>
    %64 = vector.broadcast %22 : vector<1x128xf32> to vector<4x128xf32>
    %65 = arith.addf %63, %64 : vector<4x128xf32>
    %c0_37 = arith.constant 0 : index
    %c0_38 = arith.constant 0 : index
    %c0_39 = arith.constant 0 : index
    %66 = vector.load %arg6[%c0_37, %c0_38, %c0_39] : memref<1x4x256xf32, #tpu.memory_space<vmem>>, vector<1x4x128xf32>
    %67 = vector.shape_cast %66 : vector<1x4x128xf32> to vector<4x128xf32>
    %68 = vector.shape_cast %49 : vector<4x128xf32> to vector<1x4x128xf32>
    tpu.vector_store %arg6[%c0_37, %c0_38, %c0_39], %68 {strides = array<i32>} : memref<1x4x256xf32, #tpu.memory_space<vmem>>, vector<1x4x128xf32>,
    %69 = arith.addf %59, %65 : vector<4x128xf32>
    %c0_40 = arith.constant 0 : index
    %c0_41 = arith.constant 0 : index
    %c128_42 = arith.constant 128 : index
    %70 = vector.load %arg6[%c0_40, %c0_41, %c128_42] : memref<1x4x256xf32, #tpu.memory_space<vmem>>, vector<1x4x128xf32>
    %71 = vector.shape_cast %70 : vector<1x4x128xf32> to vector<4x128xf32>
    %72 = vector.shape_cast %69 : vector<4x128xf32> to vector<1x4x128xf32>
    tpu.vector_store %arg6[%c0_40, %c0_41, %c128_42], %72 {strides = array<i32>} : memref<1x4x256xf32, #tpu.memory_space<vmem>>, vector<1x4x128xf32>,
    return
  }
  func.func @transform_0(%arg0: i32) -> (i32, i32, i32) {
    %c0_i32 = arith.constant 0 : i32
    %c0_i32_0 = arith.constant 0 : i32
    %c0_i32_1 = arith.constant 0 : i32
    return %arg0, %c0_i32, %c0_i32_0 : i32, i32, i32
  }
  func.func @transform_1(%arg0: i32) -> (i32, i32, i32) {
    %c0_i32 = arith.constant 0 : i32
    %c0_i32_0 = arith.constant 0 : i32
    %c0_i32_1 = arith.constant 0 : i32
    return %arg0, %c0_i32, %c0_i32_0 : i32, i32, i32
  }
  func.func @transform_2(%arg0: i32) -> (i32, i32, i32) {
    %c0_i32 = arith.constant 0 : i32
    %c0_i32_0 = arith.constant 0 : i32
    %c0_i32_1 = arith.constant 0 : i32
    return %arg0, %c0_i32, %c0_i32_0 : i32, i32, i32
  }
  func.func @transform_3(%arg0: i32) -> (i32, i32) {
    %c0_i32 = arith.constant 0 : i32
    %c0_i32_0 = arith.constant 0 : i32
    %c0_i32_1 = arith.constant 0 : i32
    return %c0_i32, %c0_i32_0 : i32, i32
  }
  func.func @transform_4(%arg0: i32) -> (i32, i32) {
    %c0_i32 = arith.constant 0 : i32
    %c0_i32_0 = arith.constant 0 : i32
    %c0_i32_1 = arith.constant 0 : i32
    return %c0_i32, %c0_i32_0 : i32, i32
  }
  func.func @transform_5(%arg0: i32) -> (i32, i32, i32) {
    %c0_i32 = arith.constant 0 : i32
    %c0_i32_0 = arith.constant 0 : i32
    %c0_i32_1 = arith.constant 0 : i32
    return %arg0, %c0_i32, %c0_i32_0 : i32, i32, i32
  }
}

</mosaic_0001>

<bundles_post_ra>
// kernel: step_predictor_forward.1
= control target key start
LH: loop header
LB: loop body
LE: loop exit
PB: predicated region body
PF: predicated region fallthrough
CT: control target
= control target key end

     0   :  { %10 = vsyncpa [#allocation3], 0  ;;  %s1777_s18 = smov 0   ;;  %s1903_s0 = inlined_call_operand.vmem [shape: f32[2,32,32], index: 0, kind: input, shape index: {}]   ;;  %s1904_s1 = inlined_call_operand.vmem [shape: f32[2,4,32], index: 1, kind: input, shape index: {}]   ;;  %s1905_s2 = inlined_call_operand.vmem [shape: f32[2,32,20], index: 2, kind: input, shape index: {}]   ;;  %s1906_s3 = inlined_call_operand.hbm [shape: bf16[896,256], index: 3, kind: input, shape index: {}]   ;;  %s1907_s4 = inlined_call_operand.vmem [shape: f32[8,256], index: 4, kind: input, shape index: {}]   ;;  %s1908_s5 = inlined_call_operand.vmem [shape: f32[2,4,256], index: 5, kind: output, shape index: {}]  }
   0x1 LB: > { %s1783_s19 = sadd.s32 4294967295, %s1739_s18   ;;  %p1355_p0 = scmp.ge.s32.totalorder %s1739_s18, 1  ;;  %s1739_s18 = sphi %s1777_s18, %s16_s18  }
   0x2   : > { %p167_p1 = scmp.lt.s32.totalorder %s1739_s18, 3  ;;  %s1741_s20 = smov [#allocation2]  }
   0x3   : > { %s179_s21 = sshll.u32 %s1741_s20, 4  ;;  %p1909_p3 = scmp.eq.s32.totalorder %s1783_s19, 0  ;;  %s180_s21 = int_to_ptr.vmem [resolvable:$true] %s179_s21 }
   0x4   : > { %p1787_p2 = pnand %p1355_p0, %p167_p1  ;;  %s1701_s26 = scalar_lea.hbm %s1906_s3, 14336 }
   0x5   : > { %p1702_p6 = scmp.ne.s32.totalorder %s1906_s3, %s1701_s26  ;;  %p1708_p10 = scmp.lt.u32.totalorder %s1701_s26, %s1906_s3 }
   0x6   : > { %s1911_s22 = scalar_select %p1787_p2, 1, 0 }
   0x7   : > { %p1615_p4 = pneg %p1787_p2 }
   0x9   : > { %p1796_p5 = pnand %p1909_p3, %p1615_p4 }
   0xb   : > { %p1703_p7 = pneg %p1796_p5 }
   0xd   : > { %p1704_p8 = pnand %p1703_p7, %p1702_p6 }
   0xf   : > { %p1705_p9 = pneg %p1704_p8 }
  0x11   : > { %p1710_p11 = pnand %p1708_p10, %p1705_p9 }
  0x13   : > { %1713 = shalt.err (!%p1710_p11)
}
  0x14   : > { %s1714_s6 = scalar_lea.vmem %s180_s21, 14336  ;;  %p1722_p1 = scmp.lt.s32.totalorder %s180_s21, %s180_s21 }
  0x15   : > { %p1715_p12 = scmp.ne.s32.totalorder %s180_s21, %s1714_s6  ;;  %p1723_p4 = scmp.lt.s32.totalorder %s1714_s6, %s1714_s6 }
  0x17   : > { %p1717_p13 = pnand %p1715_p12, %p1703_p7  ;;  %p1724_p3 = por %p1723_p4, %p1722_p1 }
  0x19   : > { %p1718_p0 = pneg %p1717_p13 }
  0x1b   : > { %p1725_p2 = pnand %p1724_p3, %p1718_p0 }
  0x1d   : > { %1728 = shalt.err (!%p1725_p2)
}
  0x1e   : > { %s1742_s7 = smov 128   ;;  %s1743_s8 = smov 8  }
  0x1f   : > { %1618 = dma.hbm_to_vmem [thread:$0]  (!%p1796_p5), %s1906_s3, 14336, %s180_s21, [#allocation3], %s1742_s7, %s1742_s7, %s1743_s8  }
  0x20   : > { %p1913_p6 = scmp.ne.s32.totalorder %s1911_s22, 0 }
  0x21   : > { %p1914_p8 = scmp.eq.s32.totalorder (!%p1913_p6), %s1783_s19, 0 }
  0x22   : > { %221 = sbr.rel (%p1913_p6) target bundleno = 2272 (0x8e0), region = 40 }
  0x29   : > { %1734 = dma.done.wait (%p1914_p8), [#allocation3], 14336   ;;  %p1915_p7 = pmov %p1914_p8 }
  0x2a   : > { %p258_p2 = scmp.lt.s32.totalorder %s1783_s19, 1  ;;  %vm416_vm0 = vcmask 1041408   ;;  %v1635_v0 = vld [vmem:[#allocation2] ss:$8 sps:$4 sm:$0xff]   ;;  %vm409_vm1 = vcmask 162816   ;;  %vm471_vm2 = vcmask 261120  }
  0x2b   : > { %1736 = vsyncadd (%p1915_p7), [#allocation3], 4294952960  ;;  %v1636_v1 = vld [vmem:[#allocation2 + $0x10] ss:$0 sps:$4 sm:$0x33]   ;;  %1510 = vmatprep.subr.bf16.mxu0 %v1635_v0  ;;  %vm1745_vm3 = vmmov 0  }
  0x2c   : > { %s1917_s19 = smov (!%p258_p2, %s1783_s19), 1  ;;  %1511 = vmatpush3.bf16.msra.mxu0 %v1635_v0  ;;  %v418_v4 = vsel %vm416_vm0, %v1636_v1, 0  ;;  %v1637_v20 = vld [vmem:[#allocation2 + $0x80] ss:$8 sps:$4 sm:$0xff]   ;;  %v1638_v22 = vld [vmem:[#allocation2 + $0x90] ss:$8 sps:$4 sm:$0xff]  }
  0x2d   : > { %s1437_s11 = sshll.u32 %s1917_s19, 5  ;;  %1610 = vmatprep.subr.msk.bf16.mxu0 %vm416_vm0, %v1636_v1  ;;  %v1639_v23 = vld [vmem:[#allocation2 + $0xa0] ss:$8 sps:$4 sm:$0xff]   ;;  %v1640_v24 = vld [vmem:[#allocation2 + $0xb0] ss:$8 sps:$4 sm:$0xff]   ;;  %s1362_s28 = sshll.u32 %s1917_s19, 2 }
  0x2e   : > { %s271_s14 = scalar_lea.vmem %s1905_s2, %s1437_s11  ;;  %s262_s17 = scalar_lea.vmem %s1903_s0, %s1437_s11  ;;  %v1641_v25 = vld [vmem:[#allocation2 + $0xc0] ss:$8 sps:$4 sm:$0xff]   ;;  %v1642_v26 = vld [vmem:[#allocation2 + $0xd0] ss:$8 sps:$4 sm:$0xff]  }
  0x2f   : > { %v286_v2 = vld [vmem:[%s271_s14] sm:$0xff]  ;;  %v287_v3 = vld [vmem:[%s271_s14 + $0x8] sm:$0xff]  ;;  %v288_v6 = vld [vmem:[%s271_s14 + $0x10] sm:$0xff]  ;;  %s266_s6 = scalar_lea.vmem %s1904_s1, %s1362_s28  ;;  %s1439_s7 = sshll.u32 %s1917_s19, 3 }
  0x30   : > { %v290_v5 = vpack.c.bf16 %v287_v3, %v286_v2  ;;  %v289_v7 = vld [vmem:[%s271_s14 + $0x18] sm:$0xff]  ;;  %1513 = vmatpush3.bf16.msra.mxu0 %v418_v4  ;;  %v278_v9 = vld [vmem:[%s262_s17] sm:$0xff]  ;;  %v279_v10 = vld [vmem:[%s262_s17 + $0x8] sm:$0xff]  ;;  %s1878_s12 = scalar_lea.vmem %s1908_s5, %s1439_s7 }
  0x31   : > { %v291_v8 = vpack.c.bf16 %v289_v7, %v288_v6  ;;  %v1833_v11 = vpack.c.bf16 %v279_v10, %v278_v9  ;;  %v280_v18 = vld [vmem:[%s262_s17 + $0x10] sm:$0xff]  ;;  %v281_v19 = vld [vmem:[%s262_s17 + $0x18] sm:$0xff]  ;;  %v1643_v27 = vld [vmem:[#allocation2 + $0xe0] ss:$8 sps:$4 sm:$0xff]  }
  0x32   : > { %1514 = vmatprep.mubr.msk.bf16.mxu0 %vm409_vm1, %v290_v5  ;;  %v1839_v21 = vpack.c.bf16 %v281_v19, %v280_v18  ;;  %v1644_v28 = vld [vmem:[#allocation2 + $0xf0] ss:$8 sps:$4 sm:$0xff]   ;;  %v391_v29 = vld [vmem:[%s1907_s4] ss:$0 sm:$0xff]  ;;  %v392_v30 = vld [vmem:[%s1907_s4 + $0x1] ss:$0 sm:$0xff] }
  0x33   : > { %1515 = vmatmul.mubr.msk.bf16.vlgmr.msra.gmra.mrb[0].mxu0 %vm409_vm1, %v291_v8  ;;  %1550 = vmatprep.mubr.msk.bf16.mxu1 %vm471_vm2, %v1833_v11  ;;  %v1645_v55 = vld [vmem:[#allocation2 + $0x100] ss:$8 sps:$4 sm:$0xff]   ;;  %v1646_v56 = vld [vmem:[#allocation2 + $0x110] ss:$8 sps:$4 sm:$0xff]  }
  0x34   : > { %1522 = vmatprep.mubr.msk.bf16.mxu0 %vm471_vm2, %v1833_v11  ;;  %v1647_v57 = vld [vmem:[#allocation2 + $0x120] ss:$8 sps:$4 sm:$0xff]   ;;  %v1648_v58 = vld [vmem:[#allocation2 + $0x130] ss:$8 sps:$4 sm:$0xff]  }
  0x35   : > { %v1649_v59 = vld [vmem:[#allocation2 + $0x140] ss:$8 sps:$4 sm:$0xff]   ;;  %v1650_v60 = vld [vmem:[#allocation2 + $0x150] ss:$8 sps:$4 sm:$0xff]  }
  0x36   : > { %v1651_v61 = vld [vmem:[#allocation2 + $0x160] ss:$8 sps:$4 sm:$0xff]   ;;  %v1652_v62 = vld [vmem:[#allocation2 + $0x170] ss:$8 sps:$4 sm:$0xff]  }
  0x37   : > { %v393_v63 = vld [vmem:[%s1907_s4 + $0x2] ss:$0 sm:$0xff]  ;;  %v394_v0 = vld [vmem:[%s1907_s4 + $0x3] ss:$0 sm:$0xff] }
 0x106   : > { %v1516_v12 = vpop.f32.mrb[0].mxu0 }
 0x107   : > { %v454_v13 = vpop.f32.mrb[1].mxu0 }
 0x108   : > { %v1517_v14 = vpop.f32.mrb[2].mxu0 }
 0x109   : > { %v470_v15 = vpack.c.bf16 %v1517_v14, %v1516_v12  ;;  %v457_v16 = vpop.f32.mrb[3].mxu0 }
 0x10a   : > { %v469_v17 = vpack.c.bf16 %v457_v16, %v454_v13 }
 0x10c   : > { %1518 = vmatprep.subr.bf16.mxu0 %v469_v17 }
 0x10d   : > { %1519 = vmatpush3.bf16.msra.mxu0 %v469_v17 }
 0x10e   : > { %1520 = vmatprep.subr.bf16.mxu0 %v470_v15 }
 0x111   : > { %1521 = vmatpush3.bf16.msra.mxu0 %v470_v15 }
 0x112   : > { %1526 = vmatprep.subr.bf16.mxu0 %v1637_v20 }
 0x114   : > { %1523 = vmatmul.mubr.msk.bf16.vlgmr.msra.gmra.mrb[4].mxu0 %vm471_vm2, %v1839_v21 }
 0x115   : > { %1527 = vmatpush3.bf16.msra.mxu0 %v1637_v20 }
 0x116   : > { %1528 = vmatprep.subr.bf16.mxu0 %v1638_v22 }
 0x119   : > { %1529 = vmatpush3.bf16.msra.mxu0 %v1638_v22 }
 0x11a   : > { %1530 = vmatprep.subr.bf16.mxu0 %v1639_v23 }
 0x11d   : > { %1531 = vmatpush3.bf16.msra.mxu0 %v1639_v23 }
 0x11e   : > { %1532 = vmatprep.subr.bf16.mxu0 %v1640_v24 }
 0x121   : > { %1533 = vmatpush3.bf16.msra.mxu0 %v1640_v24 }
 0x122   : > { %1534 = vmatprep.subr.bf16.mxu0 %v1641_v25 }
 0x125   : > { %1535 = vmatpush3.bf16.msra.mxu0 %v1641_v25 }
 0x126   : > { %1536 = vmatprep.subr.bf16.mxu0 %v1642_v26 }
 0x129   : > { %1537 = vmatpush3.bf16.msra.mxu0 %v1642_v26  ;;  %v1744_v26 = vmov 0.0  }
 0x12a   : > { %1538 = vmatprep.subr.bf16.mxu0 %v1643_v27 }
 0x12d   : > { %1539 = vmatpush3.bf16.msra.mxu0 %v1643_v27  ;;  %v1653_v27 = vld [vmem:[#allocation2 + $0x180] ss:$8 sps:$4 sm:$0xff]  }
 0x12e   : > { %1540 = vmatprep.subr.bf16.mxu0 %v1644_v28 }
 0x131   : > { %1541 = vmatpush3.bf16.msra.mxu0 %v1644_v28  ;;  %v1655_v28 = vld [vmem:[#allocation2 + $0x184] ss:$8 sps:$4 sm:$0xff]  }
 0x1e7   : > { %v1524_v31 = vpop.f32.mrb[4].mxu0 }
 0x1e8   : > { %v529_v32 = vmul.f32 %v1524_v31, %v391_v29  ;;  %v512_v33 = vpop.f32.mrb[5].mxu0  ;;  %v1661_v31 = vld [vmem:[#allocation2 + $0x1a4] ss:$8 sps:$4 sm:$0xff]  }
 0x1e9   : > { %v527_v34 = vmul.f32 %v512_v33, %v391_v29  ;;  %v1525_v35 = vpop.f32.mrb[6].mxu0  ;;  %v1664_v33 = vld [vmem:[#allocation2 + $0x1b4] ss:$8 sps:$4 sm:$0xff]  }
 0x1ea   : > { %v533_v36 = vadd.f32 %v529_v32, %v392_v30  ;;  %v530_v37 = vmul.f32 %v1525_v35, %v391_v29  ;;  %v515_v38 = vpop.f32.mrb[7].mxu0  ;;  %v1659_v32 = vld [vmem:[#allocation2 + $0x1a0] ss:$8 sps:$4 sm:$0xff]  }
 0x1eb   : > { %v531_v39 = vadd.f32 %v527_v34, %v392_v30  ;;  %v528_v40 = vmul.f32 %v515_v38, %v391_v29  ;;  %v1658_v29 = vld [vmem:[#allocation2 + $0x194] ss:$8 sps:$4 sm:$0xff]   ;;  %v1667_v34 = vld [vmem:[#allocation2 + $0x1c4] ss:$8 sps:$4 sm:$0xff]   ;;  %v1665_v35 = vld [vmem:[#allocation2 + $0x1c0] ss:$8 sps:$4 sm:$0xff]  }
 0x1ec   : > { %v534_v41 = vadd.f32 %v530_v37, %v392_v30  ;;  %v537_v43 = vmax.f32 %v533_v36, 0.0  ;;  %v1670_v36 = vld [vmem:[#allocation2 + $0x1d4] ss:$8 sps:$4 sm:$0xff]   ;;  %v1668_v37 = vld [vmem:[#allocation2 + $0x1d0] ss:$8 sps:$4 sm:$0xff]  }
 0x1ed   : > { %v532_v42 = vadd.f32 %v528_v40, %v392_v30  ;;  %v535_v45 = vmax.f32 %v531_v39, 0.0  ;;  %v1656_v30 = vld [vmem:[#allocation2 + $0x190] ss:$8 sps:$4 sm:$0xff]   ;;  %v1673_v38 = vld [vmem:[#allocation2 + $0x1e4] ss:$8 sps:$4 sm:$0xff]  }
 0x1ee   : > { %v538_v44 = vmax.f32 %v534_v41, 0.0  ;;  %v1671_v39 = vld [vmem:[#allocation2 + $0x1e0] ss:$8 sps:$4 sm:$0xff]  }
 0x1ef   : > { %v536_v46 = vmax.f32 %v532_v42, 0.0 }
 0x1f0   : > { %v540_v47 = vpack.c.bf16 %v538_v44, %v537_v43 }
 0x1f1   : > { %v539_v48 = vpack.c.bf16 %v536_v46, %v535_v45  ;;  %v284_v46 = vld [vmem:[%s266_s6] sm:$0xf] }
 0x1f3   : > { %1542 = vmatprep.mubr.bf16.mxu0 %v539_v48  ;;  %v1676_v48 = vld [vmem:[#allocation2 + $0x1f4] ss:$8 sps:$4 sm:$0xff]  }
 0x1f4   : > { %1543 = vmatmul.mubr.bf16.vlgmr.msra.gmra.mrb[8].mxu0 %v540_v47  ;;  %v285_v47 = vpack.c.bf16 %v284_v46, %v284_v46 }
 0x1f5   : > { %1578 = vmatprep.mubr.msk.bf16.mxu0 %vm471_vm2, %v1833_v11 }
 0x2c7   : > { %v1544_v49 = vpop.f32.mrb[8].mxu0 }
 0x2c8   : > { %v623_v50 = vpop.f32.mrb[9].mxu0 }
 0x2c9   : > { %v1545_v51 = vpop.f32.mrb[10].mxu0 }
 0x2ca   : > { %v639_v52 = vpack.c.bf16 %v1545_v51, %v1544_v49  ;;  %v626_v53 = vpop.f32.mrb[11].mxu0  ;;  %v1674_v49 = vld [vmem:[#allocation2 + $0x1f0] ss:$8 sps:$4 sm:$0xff]   ;;  %v1677_v51 = vld [vmem:[#allocation2 + $0x280] ss:$8 sps:$4 sm:$0xff]  }
 0x2cb   : > { %v638_v54 = vpack.c.bf16 %v626_v53, %v623_v50  ;;  %v1746_v50 = vmov 0   ;;  %v1679_v53 = vld [vmem:[#allocation2 + $0x290] ss:$8 sps:$4 sm:$0xff]  }
 0x2cd   : > { %1546 = vmatprep.subr.bf16.mxu1 %v638_v54 }
 0x2ce   : > { %1547 = vmatpush3.bf16.msra.mxu1 %v638_v54  ;;  %v1680_v54 = vld [vmem:[#allocation2 + $0x210] ss:$8 sps:$4 sm:$0xff]  }
 0x2cf   : > { %1548 = vmatprep.subr.bf16.mxu1 %v639_v52 }
 0x2d2   : > { %1549 = vmatpush3.bf16.msra.mxu1 %v639_v52  ;;  %v1678_v52 = vld [vmem:[#allocation2 + $0x200] ss:$8 sps:$4 sm:$0xff]  }
 0x2d3   : > { %1554 = vmatprep.subr.bf16.mxu1 %v1645_v55 }
 0x2d5   : > { %1551 = vmatmul.mubr.msk.bf16.vlgmr.msra.gmra.mrb[0].mxu1 %vm471_vm2, %v1839_v21 }
 0x2d6   : > { %1555 = vmatpush3.bf16.msra.mxu1 %v1645_v55  ;;  %v1681_v55 = vld [vmem:[#allocation2 + $0x2a0] ss:$8 sps:$4 sm:$0xff]  }
 0x2d7   : > { %1556 = vmatprep.subr.bf16.mxu1 %v1646_v56 }
 0x2da   : > { %1557 = vmatpush3.bf16.msra.mxu1 %v1646_v56  ;;  %v1682_v56 = vld [vmem:[#allocation2 + $0x220] ss:$8 sps:$4 sm:$0xff]  }
 0x2db   : > { %1558 = vmatprep.subr.bf16.mxu1 %v1647_v57 }
 0x2de   : > { %1559 = vmatpush3.bf16.msra.mxu1 %v1647_v57  ;;  %v1683_v57 = vld [vmem:[#allocation2 + $0x2b0] ss:$8 sps:$4 sm:$0xff]  }
 0x2df   : > { %1560 = vmatprep.subr.bf16.mxu1 %v1648_v58 }
 0x2e2   : > { %1561 = vmatpush3.bf16.msra.mxu1 %v1648_v58  ;;  %v1684_v58 = vld [vmem:[#allocation2 + $0x230] ss:$8 sps:$4 sm:$0xff]  }
 0x2e3   : > { %1562 = vmatprep.subr.bf16.mxu1 %v1649_v59 }
 0x2e6   : > { %1563 = vmatpush3.bf16.msra.mxu1 %v1649_v59  ;;  %v1685_v59 = vld [vmem:[#allocation2 + $0x2c0] ss:$8 sps:$4 sm:$0xff]  }
 0x2e7   : > { %1564 = vmatprep.subr.bf16.mxu1 %v1650_v60 }
 0x2ea   : > { %1565 = vmatpush3.bf16.msra.mxu1 %v1650_v60  ;;  %v1686_v60 = vld [vmem:[#allocation2 + $0x240] ss:$8 sps:$4 sm:$0xff]  }
 0x2eb   : > { %1566 = vmatprep.subr.bf16.mxu1 %v1651_v61 }
 0x2ee   : > { %1567 = vmatpush3.bf16.msra.mxu1 %v1651_v61  ;;  %v1687_v61 = vld [vmem:[#allocation2 + $0x2d0] ss:$8 sps:$4 sm:$0xff]  }
 0x2ef   : > { %1568 = vmatprep.subr.bf16.mxu1 %v1652_v62 }
 0x2f2   : > { %1569 = vmatpush3.bf16.msra.mxu1 %v1652_v62  ;;  %v1688_v62 = vld [vmem:[#allocation2 + $0x250] ss:$8 sps:$4 sm:$0xff]  }
 0x2f3   : > { %988 = vmatprep.subr.bf16.mxu1 %v1655_v28 }
 0x3a8   : > { %v1552_v1 = vpop.f32.mrb[0].mxu1 }
 0x3a9   : > { %v691_v2 = vmul.f32 %v1552_v1, %v393_v63  ;;  %v674_v3 = vpop.f32.mrb[1].mxu1 }
 0x3aa   : > { %v689_v4 = vmul.f32 %v674_v3, %v393_v63  ;;  %v1553_v5 = vpop.f32.mrb[2].mxu1 }
 0x3ab   : > { %v695_v6 = vadd.f32 %v691_v2, %v394_v0  ;;  %v692_v7 = vmul.f32 %v1553_v5, %v393_v63  ;;  %v677_v8 = vpop.f32.mrb[3].mxu1 }
 0x3ac   : > { %v693_v9 = vadd.f32 %v689_v4, %v394_v0  ;;  %v690_v10 = vmul.f32 %v677_v8, %v393_v63  ;;  %v395_v63 = vld [vmem:[%s1907_s4 + $0x4] ss:$0 sm:$0xff]  ;;  %v1691_v8 = vld [vmem:[#allocation2 + $0x2f0] ss:$8 sps:$4 sm:$0xff]  }
 0x3ad   : > { %v696_v11 = vadd.f32 %v692_v7, %v394_v0  ;;  %v699_v13 = vmax.f32 %v695_v6, 0.0  ;;  %v1689_v6 = vld [vmem:[#allocation2 + $0x2e0] ss:$8 sps:$4 sm:$0xff]  }
 0x3ae   : > { %v694_v12 = vadd.f32 %v690_v10, %v394_v0  ;;  %v697_v15 = vmax.f32 %v693_v9, 0.0  ;;  %v1690_v7 = vld [vmem:[#allocation2 + $0x260] ss:$8 sps:$4 sm:$0xff]   ;;  %v1692_v9 = vld [vmem:[#allocation2 + $0x270] ss:$8 sps:$4 sm:$0xff]  }
 0x3af   : > { %v700_v14 = vmax.f32 %v696_v11, 0.0  ;;  %v1693_v10 = vld [vmem:[#allocation2 + $0x300] ss:$8 sps:$4 sm:$0xff]   ;;  %v1694_v11 = vld [vmem:[#allocation2 + $0x310] ss:$8 sps:$4 sm:$0xff]  }
 0x3b0   : > { %v698_v16 = vmax.f32 %v694_v12, 0.0  ;;  %v1695_v12 = vld [vmem:[#allocation2 + $0x320] ss:$8 sps:$4 sm:$0xff]  }
 0x3b1   : > { %v702_v17 = vpack.c.bf16 %v700_v14, %v699_v13  ;;  %v1696_v13 = vld [vmem:[#allocation2 + $0x330] ss:$8 sps:$4 sm:$0xff]   ;;  %v1697_v14 = vld [vmem:[#allocation2 + $0x340] ss:$8 sps:$4 sm:$0xff]  }
 0x3b2   : > { %v701_v18 = vpack.c.bf16 %v698_v16, %v697_v15  ;;  %v1698_v15 = vld [vmem:[#allocation2 + $0x350] ss:$8 sps:$4 sm:$0xff]   ;;  %v898_v16 = vlaneseq }
 0x3b4   : > { %1570 = vmatprep.mubr.bf16.mxu1 %v701_v18 }
 0x3b5   : > { %1571 = vmatmul.mubr.bf16.vlgmr.msra.gmra.mrb[4].mxu1 %v702_v17  ;;  %v899_v17 = vshrl.u32 %v898_v16, 7 }
 0x3b6   : > { %989 = vmatpush1.bf16.msra.mxu1 %v1653_v27  ;;  %1020 = vmatprep.mubr.bf16.mxu1 %v1746_v50 }
 0x3b7   : > { %990 = vmatprep.subr.bf16.mxu1 %v1658_v29  ;;  %v900_v18 = vsub.s32 0, %v899_v17 }
 0x3ba   : > { %991 = vmatpush1.bf16.msra.mxu1 %v1656_v30 }
 0x3bb   : > { %992 = vmatprep.subr.bf16.mxu1 %v1661_v31 }
 0x3be   : > { %993 = vmatpush1.bf16.msra.mxu1 %v1659_v32 }
 0x3bf   : > { %994 = vmatprep.subr.bf16.mxu1 %v1664_v33 }
 0x488   : > { %v1572_v19 = vpop.f32.mrb[4].mxu1 }
 0x489   : > { %v785_v20 = vpop.f32.mrb[5].mxu1 }
 0x48a   : > { %v1573_v22 = vpop.f32.mrb[6].mxu1 }
 0x48b   : > { %v801_v23 = vpack.c.bf16 %v1573_v22, %v1572_v19  ;;  %v788_v24 = vpop.f32.mrb[7].mxu1  ;;  %v1367_v19 = vld [vmem:[%s1907_s4 + $0x5] ss:$8 sm:$0x3] }
 0x48c   : > { %v800_v25 = vpack.c.bf16 %v788_v24, %v785_v20  ;;  %v904_v20 = vsub.s32 1, %v899_v17  ;;  %v901_v22 = vrot.slane %v1367_v19, %v900_v18 }
 0x48e   : > { %1574 = vmatprep.subr.bf16.mxu0 %v800_v25 }
 0x48f   : > { %1575 = vmatpush3.bf16.msra.mxu0 %v800_v25 }
 0x490   : > { %1576 = vmatprep.subr.bf16.mxu0 %v801_v23 }
 0x493   : > { %1577 = vmatpush3.bf16.msra.mxu0 %v801_v23  ;;  %v905_v23 = vrot.slane %v1367_v19, %v904_v20 }
 0x494   : > { %1582 = vmatprep.subr.bf16.mxu0 %v1744_v26 }
 0x496   : > { %1579 = vmatmul.mubr.msk.bf16.vlgmr.msra.gmra.mrb[12].mxu0 %vm471_vm2, %v1839_v21  ;;  %v1662_v21 = vld [vmem:[#allocation2 + $0x1b0] ss:$8 sps:$4 sm:$0xff]  }
 0x497   : > { %1586 = vmatprep.mubr.msk.bf16.mxu0 %vm1745_vm3, %v1744_v26  ;;  %995 = vmatpush1.bf16.msra.mxu1 %v1662_v21 }
 0x498   : > { %996 = vmatprep.subr.bf16.mxu1 %v1667_v34  ;;  %v1699_v34 = vld [vmem:[#allocation2 + $0x360] ss:$8 sps:$4 sm:$0xff]  }
 0x49b   : > { %997 = vmatpush1.bf16.msra.mxu1 %v1665_v35  ;;  %v1700_v35 = vld [vmem:[#allocation2 + $0x370] ss:$8 sps:$4 sm:$0xff]  }
 0x49c   : > { %998 = vmatprep.subr.bf16.mxu1 %v1670_v36 }
 0x49f   : > { %999 = vmatpush1.bf16.msra.mxu1 %v1668_v37  ;;  %v398_v37 = vld [vmem:[%s1907_s4 + $0x6] ss:$0 sm:$0xff] }
 0x4a0   : > { %1000 = vmatprep.subr.bf16.mxu1 %v1673_v38 }
 0x4a3   : > { %1001 = vmatpush1.bf16.msra.mxu1 %v1671_v39 }
 0x4a4   : > { %1002 = vmatprep.subr.bf16.mxu1 %v1676_v48 }
 0x4a7   : > { %1003 = vmatpush1.bf16.msra.mxu1 %v1674_v49 }
 0x4a8   : > { %1590 = vmatprep.subr.bf16.mxu1 %v1744_v26 }
 0x569   : > { %v1580_v40 = vpop.f32.mrb[12].mxu0 }
 0x56a   : > { %v836_v41 = vpop.f32.mrb[13].mxu0 }
 0x56b   : > { %v1581_v42 = vpop.f32.mrb[14].mxu0 }
 0x56c   : > { %v852_v43 = vpack.c.bf16 %v1581_v42, %v1580_v40  ;;  %v839_v44 = vpop.f32.mrb[15].mxu0 }
 0x56d   : > { %v851_v45 = vpack.c.bf16 %v839_v44, %v836_v41 }
 0x56f   : > { %1583 = vmatpush3.bf16.msra.mxu0 %v851_v45 }
 0x570   : > { %1584 = vmatprep.subr.bf16.mxu0 %v1744_v26 }
 0x573   : > { %1585 = vmatpush3.bf16.msra.mxu0 %v852_v43 }
 0x574   : > { %1479 = vmatprep.subr.bf16.mxu0 %v1677_v51 }
 0x576   : > { %1587 = vmatmul.mubr.msk.bf16.vlgmr.msra.gmra.mrb[16].mxu0 %vm471_vm2, %v285_v47 }
 0x577   : > { %1480 = vmatpush3.bf16.msra.mxu0 %v1678_v52 }
 0x578   : > { %1481 = vmatprep.subr.bf16.mxu0 %v1679_v53 }
 0x57b   : > { %1482 = vmatpush3.bf16.msra.mxu0 %v1680_v54 }
 0x57c   : > { %1483 = vmatprep.subr.bf16.mxu0 %v1681_v55 }
 0x57f   : > { %1484 = vmatpush3.bf16.msra.mxu0 %v1682_v56 }
 0x580   : > { %1485 = vmatprep.subr.bf16.mxu0 %v1683_v57 }
 0x583   : > { %1486 = vmatpush3.bf16.msra.mxu0 %v1684_v58 }
 0x584   : > { %1487 = vmatprep.subr.bf16.mxu0 %v1685_v59 }
 0x587   : > { %1488 = vmatpush3.bf16.msra.mxu0 %v1686_v60 }
 0x588   : > { %1489 = vmatprep.subr.bf16.mxu0 %v1687_v61 }
 0x58b   : > { %1490 = vmatpush3.bf16.msra.mxu0 %v1688_v62 }
 0x58c   : > { %1491 = vmatprep.subr.bf16.mxu0 %v1689_v6 }
 0x58f   : > { %1492 = vmatpush3.bf16.msra.mxu0 %v1690_v7 }
 0x590   : > { %1493 = vmatprep.subr.bf16.mxu0 %v1691_v8 }
 0x593   : > { %1494 = vmatpush3.bf16.msra.mxu0 %v1692_v9 }
 0x649   : > { %v890_v0 = vpop.f32.mrb[16].mxu0 }
 0x64a   : > { %v891_v1 = vadd.f32 %v890_v0, %v395_v63  ;;  %v1588_v2 = vpop.f32.mrb[17].mxu0 }
 0x64b   : > { %v893_v3 = vpop.f32.mrb[18].mxu0 }
 0x64c   : > { %v896_v4 = vpack.c.bf16 %v891_v1, %v891_v1  ;;  %1259 = vst [vmem:[%s1878_s12] sm:$0xf] %v891_v1  ;;  %v1589_v5 = vpop.f32.mrb[19].mxu0 }
 0x64e   : > { %1021 = vmatmul.mubr.bf16.vlgmr.msra.gmra.mrb[8].mxu1 %v896_v4 }
 0x64f   : > { %1606 = vmatprep.mubr.msk.bf16.mxu1 %vm1745_vm3, %v1744_v26  ;;  %1591 = vmatpush3.bf16.msra.mxu1 %v1693_v10 }
 0x650   : > { %1592 = vmatprep.subr.bf16.mxu1 %v1744_v26 }
 0x653   : > { %1593 = vmatpush3.bf16.msra.mxu1 %v1694_v11 }
 0x654   : > { %1594 = vmatprep.subr.bf16.mxu1 %v1744_v26 }
 0x657   : > { %1595 = vmatpush3.bf16.msra.mxu1 %v1695_v12 }
 0x658   : > { %1596 = vmatprep.subr.bf16.mxu1 %v1744_v26 }
 0x65b   : > { %1597 = vmatpush3.bf16.msra.mxu1 %v1696_v13 }
 0x65c   : > { %1598 = vmatprep.subr.bf16.mxu1 %v1744_v26 }
 0x65f   : > { %1599 = vmatpush3.bf16.msra.mxu1 %v1697_v14 }
 0x660   : > { %1600 = vmatprep.subr.bf16.mxu1 %v1744_v26 }
 0x663   : > { %1601 = vmatpush3.bf16.msra.mxu1 %v1698_v15 }
 0x664   : > { %1602 = vmatprep.subr.bf16.mxu1 %v1744_v26 }
 0x667   : > { %1603 = vmatpush3.bf16.msra.mxu1 %v1699_v34 }
 0x668   : > { %1604 = vmatprep.subr.bf16.mxu1 %v1744_v26  ;;  %v399_v26 = vld [vmem:[%s1907_s4 + $0x7] ss:$0 sm:$0xff] }
 0x66b   : > { %1605 = vmatpush3.bf16.msra.mxu1 %v1700_v35 }
 0x721   : > { %v1022_v24 = vpop.f32.mrb[8].mxu1 }
 0x722   : > { %v1023_v25 = vadd.f32 %v1022_v24, %v901_v22  ;;  %v1024_v27 = vpop.f32.mrb[9].mxu1 }
 0x723   : > { %v1025_v28 = vadd.f32 %v1024_v27, %v905_v23  ;;  %v1026_v29 = vpop.f32.mrb[10].mxu1 }
 0x724   : > { %v1029_v30 = vmax.f32 %v1023_v25, 0.0  ;;  %v1027_v31 = vpop.f32.mrb[11].mxu1 }
 0x725   : > { %v1030_v32 = vmax.f32 %v1025_v28, 0.0 }
 0x726   : > { %v1031_v21 = vpack.c.bf16 %v1029_v30, %v1029_v30 }
 0x727   : > { %v1032_v33 = vpack.c.bf16 %v1030_v32, %v1030_v32 }
 0x729   : > { %1161 = vmatprep.mubr.bf16.mxu0 %v1032_v33 }
 0x72a   : > { %1162 = vmatmul.mubr.bf16.vlgmr.msra.gmra.mrb[20].mxu0 %v1031_v21 }
 0x7fd   : > { %v1495_v36 = vpop.f32.mrb[20].mxu0 }
 0x7fe   : > { %v1496_v38 = vpop.f32.mrb[21].mxu0 }
 0x7ff   : > { %v1497_v39 = vadd.f32 %v1496_v38, %v1495_v36  ;;  %v1498_v40 = vpop.f32.mrb[22].mxu0 }
 0x800   : > { %v1499_v41 = vpop.f32.mrb[23].mxu0 }
 0x801   : > { %v1164_v42 = vadd.f32 %v1497_v39, %v398_v37 }
 0x803   : > { %v1169_v43 = vmax.f32 %v1164_v42, 0.0 }
 0x805   : > { %v1170_v44 = vpack.c.bf16 %v1169_v43, %v1169_v43 }
 0x807   : > { %1607 = vmatmul.mubr.bf16.vlgmr.msra.gmra.mrb[12].mxu1 %v1170_v44 }
 0x8da   : > { %v1253_v45 = vpop.f32.mrb[12].mxu1 }
 0x8db   : > { %v1254_v46 = vadd.f32 %v1253_v45, %v399_v26  ;;  %v1608_v47 = vpop.f32.mrb[13].mxu1 }
 0x8dc   : > { %v1256_v48 = vpop.f32.mrb[14].mxu1 }
 0x8dd   : > { %v1260_v49 = vadd.f32 %v1254_v46, %v1164_v42  ;;  %v1609_v50 = vpop.f32.mrb[15].mxu1 }
 0x8df   : > { %1261 = vst [vmem:[%s1878_s12 + $0x4] sm:$0xf] %v1260_v49 }
 0x8e0 PF: > { %s16_s18 = sadd.s32 1, %s1739_s18  }
 0x8e1   : > { %p13_p3 = scmp.ge.s32.totalorder %s16_s18, 4  }
 0x8e3   :  { %15 = sbr.rel (!%p13_p3) target bundleno = 1 (0x1), region = 82 }
 0x8ea   :  { %1283 = vsyncpa [#allocation3], 1 }
 0x8eb   :  { %1285 = vsyncpa [#allocation3 + $0x1], 1 }

</bundles_post_ra>
